<compile_context>
chip_gen: v5e
topology: v5e:2x2
jax: 0.10.0
libtpu: 0.0.40
codegen_flags: <defaults>
</compile_context>

<pallas_src>
import jax
import jax.numpy as jnp
from jax.experimental import pallas as pl
from jax.experimental.pallas import tpu as pltpu


def generator_kernel(x_ref, w_ref, b_ref, o_ref):
    # Linear: bf16 x @ bf16 W on the MXU, f32 accumulation.
    y = jnp.dot(x_ref[...], w_ref[...], preferred_element_type=jnp.float32)
    y = y + b_ref[...]                                   # (TB, 896) + (1, 896)
    # Sigmoid: exp and approx reciprocal both run on the EUP slot.
    e = jnp.exp(-y)
    o_ref[...] = pl.reciprocal(1.0 + e, approx=True).astype(o_ref.dtype)


def generator_forward(x, weight, bias, image_size=28, tb_max=256):
    """x: (B, input_size) f32; weight: (out, in) PyTorch layout; bias: (out,)."""
    B, input_size = x.shape
    out_features = image_size * image_size               # 784
    out_padded = pl.cdiv(out_features, 128) * 128        # 896 -> unmasked lane-dense vst
    pad_cols = out_padded - out_features

    # bf16 streams halve the x/W HBM bytes; the MXU still accumulates in f32.
    w_t = jnp.pad(weight.T.astype(jnp.bfloat16), ((0, 0), (0, pad_cols)))
    b2 = jnp.pad(bias.astype(jnp.float32).reshape(1, out_features),
                 ((0, 0), (0, pad_cols)))
    xb = x.astype(jnp.bfloat16)

    # Batch tiling: sublane-aligned tile TB; x / out streamed per grid step,
    # weight / bias resident across the whole grid.  TB <= 256 keeps the
    # double-buffered footprint (x tile + out tile + resident W/b) far below
    # the 32 MiB scoped VMEM limit on every chip generation.
    tb = min(tb_max, 8 * pl.cdiv(B, 8))
    b_padded = tb * pl.cdiv(B, tb)
    if b_padded != B:
        xb = jnp.pad(xb, ((0, b_padded - B), (0, 0)))

    y = pl.pallas_call(
        generator_kernel,
        out_shape=jax.ShapeDtypeStruct((b_padded, out_padded), jnp.float32),
        grid=(b_padded // tb,),
        in_specs=[
            pl.BlockSpec((tb, input_size), lambda i: (i, 0)),          # streamed x tile
            pl.BlockSpec((input_size, out_padded), lambda i: (0, 0)),  # resident weight
            pl.BlockSpec((1, out_padded), lambda i: (0, 0)),           # resident bias
        ],
        out_specs=pl.BlockSpec((tb, out_padded), lambda i: (i, 0)),
        compiler_params=pltpu.CompilerParams(
            dimension_semantics=("parallel",),   # shard batch tiles across TCs (v7x)
            vmem_limit_bytes=32 * 1024 * 1024,   # explicit, safe on v5e/v6e/v7x
        ),
    )(xb, w_t, b2)

    y = y[:B, :out_features]
    return y.reshape(-1, 1, image_size, image_size)


if __name__ == "__main__":
    image_size = 28                 # implied by .view(-1, 1, 28, 28)
    input_size = 32                 # latent dim
    batch = 2

    key = jax.random.PRNGKey(0)
    kx, kw, kb = jax.random.split(key, 3)

    # Deterministic synthetic parameters (PyTorch Linear: weight (out, in), bias (out,)).
    out_features = image_size * image_size
    bound = 1.0 / (input_size ** 0.5)
    weight = jax.random.uniform(kw, (out_features, input_size),
                                minval=-bound, maxval=bound, dtype=jnp.float32)
    bias = jax.random.uniform(kb, (out_features,),
                              minval=-bound, maxval=bound, dtype=jnp.float32)
    x = jax.random.normal(kx, (batch, input_size), dtype=jnp.float32)

    out = generator_forward(x, weight, bias, image_size=image_size)
    out = jax.block_until_ready(out)
    assert out.shape == (batch, 1, image_size, image_size)

    # Faithful reference: same bf16-cast operands the kernel streams, f32 accumulation.
    ref_bf16 = jax.nn.sigmoid(
        jnp.dot(x.astype(jnp.bfloat16), weight.T.astype(jnp.bfloat16),
                preferred_element_type=jnp.float32) + bias
    ).reshape(-1, 1, image_size, image_size)
    # Module-semantics reference in full f32 (matches the PyTorch forward).
    ref_f32 = jax.nn.sigmoid(x @ weight.T + bias).reshape(-1, 1, image_size, image_size)

    assert jnp.allclose(out, ref_bf16, atol=5e-3, rtol=5e-3)
    assert jnp.allclose(out, ref_f32, atol=2e-2, rtol=2e-2)

    print("KERNEL_OK")
</pallas_src>

<mosaic_0001>
module attributes {stable_mosaic.version = 11 : i64} {
  func.func @generator_kernel(%arg0: i32, %arg1: memref<8x32xbf16, #tpu.memory_space<vmem>>, %arg2: memref<32x896xbf16, #tpu.memory_space<vmem>>, %arg3: memref<1x896xf32, #tpu.memory_space<vmem>>, %arg4: memref<8x896xf32, #tpu.memory_space<vmem>>) attributes {dimension_semantics = [#tpu.dimension_semantics<parallel>], iteration_bounds = array<i64: 1>, scalar_prefetch = 0 : i64, scratch_operands = 0 : i64, tpu.core_type = #tpu.core_type<tc>, window_params = [{transform_indices = @transform_0, window_bounds = array<i64: 8, 32>}, {pipeline_mode = #tpu.pipeline_mode<synchronous>, transform_indices = @transform_1, window_bounds = array<i64: 32, 896>}, {pipeline_mode = #tpu.pipeline_mode<synchronous>, transform_indices = @transform_2, window_bounds = array<i64: 1, 896>}, {transform_indices = @transform_3, window_bounds = array<i64: 8, 896>}]} {
    %c0 = arith.constant 0 : index
    %c0_0 = arith.constant 0 : index
    %0 = vector.load %arg1[%c0, %c0_0] : memref<8x32xbf16, #tpu.memory_space<vmem>>, vector<8x32xbf16>
    %c0_1 = arith.constant 0 : index
    %c0_2 = arith.constant 0 : index
    %1 = vector.load %arg2[%c0_1, %c0_2] : memref<32x896xbf16, #tpu.memory_space<vmem>>, vector<32x896xbf16>
    %cst = arith.constant dense<0.000000e+00> : vector<8x896xf32>
    %2 = tpu.matmul %0, %1, %cst {dimension_numbers = #tpu.dot_dimension_numbers<[1], [0], [0], [1], [0, 0, 1, 1], [], []>} : vector<8x32xbf16>, vector<32x896xbf16>, vector<8x896xf32> -> vector<8x896xf32>
    %c0_3 = arith.constant 0 : index
    %c0_4 = arith.constant 0 : index
    %3 = vector.load %arg3[%c0_3, %c0_4] : memref<1x896xf32, #tpu.memory_space<vmem>>, vector<1x896xf32>
    %4 = vector.broadcast %3 : vector<1x896xf32> to vector<8x896xf32>
    %5 = arith.addf %2, %4 : vector<8x896xf32>
    %cst_5 = arith.constant 0.000000e+00 : f32
    %6 = vector.broadcast %cst_5 : f32 to vector<8x896xf32>
    %7 = arith.subf %6, %5 : vector<8x896xf32>
    %8 = math.exp %7 : vector<8x896xf32>
    %cst_6 = arith.constant 1.000000e+00 : f32
    %9 = vector.broadcast %cst_6 : f32 to vector<8x896xf32>
    %10 = arith.addf %9, %8 : vector<8x896xf32>
    %11 = tpu.reciprocal %10 {approx = true} : vector<8x896xf32> -> vector<8x896xf32>
    %c0_7 = arith.constant 0 : index
    %c0_8 = arith.constant 0 : index
    %12 = vector.load %arg4[%c0_7, %c0_8] : memref<8x896xf32, #tpu.memory_space<vmem>>, vector<8x896xf32>
    tpu.vector_store %arg4[%c0_7, %c0_8], %11 {strides = array<i32>} : memref<8x896xf32, #tpu.memory_space<vmem>>, vector<8x896xf32>,
    return
  }
  func.func @transform_0(%arg0: i32) -> (i32, i32) {
    %c0_i32 = arith.constant 0 : i32
    %c0_i32_0 = arith.constant 0 : i32
    return %arg0, %c0_i32 : i32, i32
  }
  func.func @transform_1(%arg0: i32) -> (i32, i32) {
    %c0_i32 = arith.constant 0 : i32
    %c0_i32_0 = arith.constant 0 : i32
    %c0_i32_1 = arith.constant 0 : i32
    return %c0_i32, %c0_i32_0 : i32, i32
  }
  func.func @transform_2(%arg0: i32) -> (i32, i32) {
    %c0_i32 = arith.constant 0 : i32
    %c0_i32_0 = arith.constant 0 : i32
    %c0_i32_1 = arith.constant 0 : i32
    return %c0_i32, %c0_i32_0 : i32, i32
  }
  func.func @transform_3(%arg0: i32) -> (i32, i32) {
    %c0_i32 = arith.constant 0 : i32
    %c0_i32_0 = arith.constant 0 : i32
    return %arg0, %c0_i32 : i32, i32
  }
}

</mosaic_0001>

<bundles_post_ra>
// kernel: tpu_custom_call.1
= control target key start
LH: loop header
LB: loop body
LE: loop exit
PB: predicated region body
PF: predicated region fallthrough
CT: control target
= control target key end

     0   :  { %8 = vsyncpa [#allocation3], 0  ;;  %s577_s0 = inlined_call_operand.hbm [shape: bf16[8,32], index: 0, kind: input, shape index: {}]   ;;  %s578_s1 = inlined_call_operand.hbm [shape: bf16[32,896], index: 1, kind: input, shape index: {}]   ;;  %s579_s2 = inlined_call_operand.hbm [shape: f32[1,896], index: 2, kind: input, shape index: {}]   ;;  %s580_s3 = inlined_call_operand.hbm [shape: f32[8,896], index: 3, kind: output, shape index: {}]  }
   0x1   :  { %9 = vsyncpa [#allocation6], 0  ;;  %s26_s14 = sshll.u32 %s578_s1, 4  ;;  %s27_s14 = int_to_ptr.hbm [resolvable:$true] %s26_s14 }
   0x2   :  { %10 = vsyncpa [#allocation4], 0  ;;  %s532_s15 = smov [#allocation5]   ;;  %s16_s19 = sshll.u32 %s577_s0, 4  ;;  %s17_s19 = int_to_ptr.hbm [resolvable:$true] %s16_s19 }
   0x3   :  { %s28_s16 = sshll.u32 %s532_s15, 4  ;;  %s533_s20 = smov 448   ;;  %s29_s16 = int_to_ptr.vmem [resolvable:$true] %s28_s16 }
   0x4   :  { %s534_s21 = smov 28   ;;  %s535_s22 = smov [#allocation2]  }
   0x5   :  { %34 = dma.hbm_to_vmem [thread:$0]  %s27_s14, 1792, %s29_s16, [#allocation6], %s533_s20, %s533_s20, %s534_s21  }
   0x6   :  { %s18_s23 = sshll.u32 %s535_s22, 4  ;;  %s40_s26 = sshll.u32 %s579_s2, 4  ;;  %s19_s23 = int_to_ptr.vmem [resolvable:$true] %s18_s23  ;;  %s41_s26 = int_to_ptr.hbm [resolvable:$true] %s40_s26 }
   0x7   :  { %21 = dma.hbm_to_vmem [thread:$0]  %s17_s19, 64, %s19_s23, [#allocation3]  }
   0x8   :  { %s536_s1 = smov [#allocation7]  }
   0x9   :  { %s42_s27 = sshll.u32 %s536_s1, 4  ;;  %s43_s27 = int_to_ptr.vmem [resolvable:$true] %s42_s27 }
   0xa   :  { %45 = dma.hbm_to_vmem [thread:$0]  %s41_s26, 112, %s43_s27, [#allocation6]  }
   0xb   :  { %526 = dma.done.wait [#allocation3], 64  }
   0xc   :  { %527 = vsyncadd [#allocation3], 4294967232 }
   0xd   :  { %528 = dma.done.wait [#allocation6], 1904  }
   0xe   :  { %529 = vsyncadd [#allocation6], 4294965392  ;;  %v349_v0 = vld [vmem:[#allocation5 + $0x38] sm:$0xf]  ;;  %v392_v1 = vld [vmem:[#allocation5 + $0x50] sm:$0xf0] }
   0xf   :  { %v389_v2 = vld [vmem:[#allocation5 + $0x3c] sm:$0xf]  ;;  %v350_v3 = vor.u32 %v392_v1, %v349_v0  ;;  %v351_v4 = vld [vmem:[#allocation5 + $0x54] sm:$0xf0]  ;;  %v357_v5 = vld [vmem:[#allocation5 + $0x40] sm:$0xf] }
  0x10   :  { %v393_v6 = vld [vmem:[#allocation5 + $0x58] sm:$0xf0]  ;;  %v354_v7 = vor.u32 %v389_v2, %v351_v4  ;;  %v321_v9 = vld [vmem:[#allocation5] sm:$0xf]  ;;  %v382_v11 = vld [vmem:[#allocation5 + $0x4] sm:$0xf] }
  0x11   :  { %v358_v8 = vor.u32 %v393_v6, %v357_v5  ;;  %v385_v10 = vld [vmem:[#allocation5 + $0x18] sm:$0xf0]  ;;  %174 = vmatpush.bf16.msra.mxu0 %v350_v3  ;;  %v323_v13 = vld [vmem:[#allocation5 + $0x1c] sm:$0xf0]  ;;  %v329_v14 = vld [vmem:[#allocation5 + $0x8] sm:$0xf] }
  0x12   :  { %v322_v12 = vor.u32 %v385_v10, %v321_v9  ;;  %v386_v15 = vld [vmem:[#allocation5 + $0x20] sm:$0xf0]  ;;  %187 = vmatpush.bf16.msra.mxu1 %v354_v7  ;;  %v326_v16 = vor.u32 %v382_v11, %v323_v13  ;;  %vm164_vm0 = vcmask 261120   ;;  %v373_v18 = vld [vmem:[#allocation5 + $0x50] sm:$0xf]  ;;  %s537_s0 = smov [#allocation8]  }
  0x13   :  { %200 = vmatpush.bf16.msra.mxu2 %v358_v8  ;;  %v330_v17 = vor.u32 %v386_v15, %v329_v14  ;;  %v395_v19 = vld [vmem:[#allocation5 + $0x68] sm:$0xf0]  ;;  %v59_v20 = vld [vmem:[#allocation2] sm:$0xf]  ;;  %v390_v22 = vld [vmem:[#allocation5 + $0x44] sm:$0xf] }
  0x14   :  { %v374_v21 = vor.u32 %v395_v19, %v373_v18  ;;  %v359_v23 = vld [vmem:[#allocation5 + $0x5c] sm:$0xf0]  ;;  %v383_v24 = vld [vmem:[#allocation5 + $0xc] sm:$0xf]  ;;  %v331_v26 = vld [vmem:[#allocation5 + $0x24] sm:$0xf0] }
  0x15   :  { %v362_v25 = vor.u32 %v390_v22, %v359_v23  ;;  %v365_v27 = vld [vmem:[#allocation5 + $0x48] sm:$0xf]  ;;  %v394_v28 = vld [vmem:[#allocation5 + $0x60] sm:$0xf0]  ;;  %175 = vmatpush.bf16.msra.mxu0 %v322_v12  ;;  %v391_v29 = vld [vmem:[#allocation5 + $0x4c] sm:$0xf]  ;;  %v334_v36 = vor.u32 %v383_v24, %v331_v26 }
  0x16   :  { %v367_v30 = vld [vmem:[#allocation5 + $0x64] sm:$0xf0]  ;;  %v345_v31 = vld [vmem:[#allocation5 + $0x18] sm:$0xf]  ;;  %188 = vmatpush.bf16.msra.mxu1 %v326_v16  ;;  %v366_v32 = vor.u32 %v394_v28, %v365_v27  ;;  %v388_v34 = vld [vmem:[#allocation5 + $0x30] sm:$0xf0] }
  0x17   :  { %201 = vmatpush.bf16.msra.mxu2 %v330_v17  ;;  %v370_v33 = vor.u32 %v391_v29, %v367_v30  ;;  %v337_v35 = vld [vmem:[#allocation5 + $0x10] sm:$0xf]  ;;  %213 = vmatpush.bf16.msra.mxu3 %v362_v25  ;;  %v346_v37 = vor.u32 %v388_v34, %v345_v31  ;;  %v387_v38 = vld [vmem:[#allocation5 + $0x28] sm:$0xf0]  ;;  %v384_v39 = vld [vmem:[#allocation5 + $0x14] sm:$0xf] }
  0x18   :  { %v339_v40 = vld [vmem:[#allocation5 + $0x2c] sm:$0xf0]  ;;  %375 = vmatmul.msk.bf16.vlgmr.msra.gmra.mxu0 %vm164_vm0, %v59_v20  ;;  %v338_v42 = vor.u32 %v387_v38, %v337_v35  ;;  %s306_s2 = sshll.u32 %s537_s0, 4  ;;  %s308_s30 = sshll.u32 %s580_s3, 4  ;;  %s307_s2 = int_to_ptr.vmem [resolvable:$true] %s306_s2  ;;  %s309_s30 = int_to_ptr.hbm [resolvable:$true] %s308_s30 }
  0x19   :  { %v342_v41 = vor.u32 %v384_v39, %v339_v40  ;;  %376 = vmatmul.msk.bf16.vlgmr.msra.gmra.mxu1 %vm164_vm0, %v59_v20  ;;  %226 = vmatpush.bf16.msrb.mxu0 %v366_v32  ;;  %v76_v43 = vld [vmem:[#allocation7] sm:$0xff] }
  0x1a   :  { %239 = vmatpush.bf16.msrb.mxu1 %v370_v33  ;;  %377 = vmatmul.msk.bf16.vlgmr.msra.gmra.mxu2 %vm164_vm0, %v59_v20  ;;  %v78_v44 = vperm.slane %v76_v43, 0  ;;  %v79_v45 = vperm.slane %v76_v43, 1  ;;  %v80_v52 = vperm.slane %v76_v43, 2  ;;  %v81_v59 = vperm.slane %v76_v43, 3 }
  0x1b   :  { %252 = vmatpush.bf16.msrb.mxu2 %v374_v21  ;;  %214 = vmatpush.bf16.msra.mxu3 %v334_v36  ;;  %v82_v1 = vperm.slane %v76_v43, 4  ;;  %v83_v4 = vperm.slane %v76_v43, 5  ;;  %v84_v17 = vperm.slane %v76_v43, 6 }
  0x1d   :  { %227 = vmatpush.bf16.msrb.mxu0 %v338_v42 }
  0x1e   :  { %240 = vmatpush.bf16.msrb.mxu1 %v342_v41  ;;  %378 = vmatmul.msk.bf16.vlgmr.msra.gmra.mxu3 %vm164_vm0, %v59_v20 }
  0x1f   :  { %253 = vmatpush.bf16.msrb.mxu2 %v346_v37 }
  0x28   :  { %379 = vmatmul.msk.bf16.vlgmr.msrb.gmra.mxu0 %vm164_vm0, %v59_v20 }
  0x29   :  { %380 = vmatmul.msk.bf16.vlgmr.msrb.gmra.mxu1 %vm164_vm0, %v59_v20 }
  0x2a   :  { %381 = vmatmul.msk.bf16.vlgmr.msrb.gmra.mxu2 %vm164_vm0, %v59_v20 }
  0x95   :  { %v177_v46 = vpop.f32.mrf.mxu0 }
  0x96   :  { %v178_v47 = vadd.f32 %v177_v46, %v78_v44  ;;  %v190_v48 = vpop.f32.mrf.mxu1 }
  0x97   :  { %v191_v49 = vadd.f32 %v190_v48, %v79_v45 }
  0x98   :  { %v259_v50 = vsub.f32 0.0, %v178_v47 }
  0x99   :  { %v260_v51 = vsub.f32 0.0, %v191_v49 }
  0x9a   :  { %v266_v53 = vmul.f32 1.442695, %v259_v50 }
  0x9b   :  { %v268_v54 = vmul.f32 1.442695, %v260_v51 }
  0x9c   :  { %402 = vpow2.f32 %v266_v53 }
  0x9d   :  { %v203_v55 = vpop.f32.mrf.mxu2  ;;  %404 = vpow2.f32 %v268_v54  ;;  %v179_v57 = vpop.f32.mrf.mxu0 }
  0x9e   :  { %v204_v56 = vadd.f32 %v203_v55, %v80_v52  ;;  %v192_v58 = vpop.f32.mrf.mxu1 }
  0xa0   :  { %v261_v60 = vsub.f32 0.0, %v204_v56 }
  0xa1   :  { %v216_v62 = vpop.f32.mrf.mxu3 }
  0xa2   :  { %v270_v61 = vmul.f32 1.442695, %v261_v60  ;;  %v403_v63 = vpop.eup %402  ;;  %v217_v0 = vadd.f32 %v216_v62, %v81_v59 }
  0xa3   :  { %v405_v2 = vpop.eup %404  ;;  %v280_v3 = vadd.f32 1.0, %v403_v63 }
  0xa4   :  { %406 = vpow2.f32 %v270_v61  ;;  %v281_v5 = vadd.f32 1.0, %v405_v2  ;;  %v262_v7 = vsub.f32 0.0, %v217_v0 }
  0xa5   :  { %v205_v6 = vpop.f32.mrf.mxu2  ;;  %408 = vrcp.f32 %v280_v3  ;;  %v229_v8 = vpop.f32.mrf.mxu0 }
  0xa6   :  { %410 = vrcp.f32 %v281_v5  ;;  %v272_v9 = vmul.f32 1.442695, %v262_v7  ;;  %v230_v10 = vadd.f32 %v229_v8, %v82_v1  ;;  %v242_v11 = vpop.f32.mrf.mxu1 }
  0xa7   :  { %v243_v12 = vadd.f32 %v242_v11, %v83_v4 }
  0xa8   :  { %412 = vpow2.f32 %v272_v9  ;;  %v263_v13 = vsub.f32 0.0, %v230_v10 }
  0xa9   :  { %v264_v15 = vsub.f32 0.0, %v243_v12  ;;  %v218_v16 = vpop.f32.mrf.mxu3 }
  0xaa   :  { %v407_v14 = vpop.eup %406  ;;  %v274_v19 = vmul.f32 1.442695, %v263_v13 }
  0xab   :  { %v282_v18 = vadd.f32 1.0, %v407_v14  ;;  %v409_v20 = vpop.eup %408  ;;  %v276_v21 = vmul.f32 1.442695, %v264_v15 }
  0xac   :  { %v411_v22 = vpop.eup %410  ;;  %294 = vst [vmem:[#allocation8] sm:$0xff] %v409_v20 }
  0xad   :  { %414 = vrcp.f32 %v282_v18  ;;  %v255_v23 = vpop.f32.mrf.mxu2  ;;  %295 = vst [vmem:[#allocation8 + $0x8] sm:$0xff] %v411_v22  ;;  %v231_v25 = vpop.f32.mrf.mxu0 }
  0xae   :  { %416 = vpow2.f32 %v274_v19  ;;  %v256_v24 = vadd.f32 %v255_v23, %v84_v17  ;;  %v413_v26 = vpop.eup %412  ;;  %v244_v27 = vpop.f32.mrf.mxu1 }
  0xaf   :  { %418 = vpow2.f32 %v276_v21  ;;  %v283_v28 = vadd.f32 1.0, %v413_v26 }
  0xb0   :  { %v265_v29 = vsub.f32 0.0, %v256_v24 }
  0xb1   :  { %420 = vrcp.f32 %v283_v28 }
  0xb2   :  { %v278_v30 = vmul.f32 1.442695, %v265_v29 }
  0xb3   :  { %v415_v31 = vpop.eup %414 }
  0xb4   :  { %v417_v32 = vpop.eup %416  ;;  %296 = vst [vmem:[#allocation8 + $0x10] sm:$0xff] %v415_v31  ;;  %422 = vpow2.f32 %v278_v30 }
  0xb5   :  { %v419_v33 = vpop.eup %418  ;;  %v284_v34 = vadd.f32 1.0, %v417_v32  ;;  %v257_v35 = vpop.f32.mrf.mxu2 }
  0xb6   :  { %v285_v36 = vadd.f32 1.0, %v419_v33 }
  0xb7   :  { %424 = vrcp.f32 %v284_v34  ;;  %v421_v37 = vpop.eup %420 }
  0xb8   :  { %426 = vrcp.f32 %v285_v36  ;;  %297 = vst [vmem:[#allocation8 + $0x18] sm:$0xff] %v421_v37 }
  0xba   :  { %v423_v38 = vpop.eup %422 }
  0xbb   :  { %v286_v39 = vadd.f32 1.0, %v423_v38 }
  0xbd   :  { %v425_v40 = vpop.eup %424  ;;  %428 = vrcp.f32 %v286_v39 }
  0xbe   :  { %v427_v41 = vpop.eup %426  ;;  %298 = vst [vmem:[#allocation8 + $0x20] sm:$0xff] %v425_v40 }
  0xbf   :  { %299 = vst [vmem:[#allocation8 + $0x28] sm:$0xff] %v427_v41 }
  0xc3   :  { %v429_v42 = vpop.eup %428 }
  0xc4   :  { %300 = vst [vmem:[#allocation8 + $0x30] sm:$0xff] %v429_v42 }
  0xc5   :  { %311 = dma.vmem_to_hbm [thread:$0]  %s307_s2, 896, %s309_s30, [#allocation4]  }
  0xc6   :  { %530 = dma.done.wait [#allocation4], 896  }
  0xc7   :  { %531 = vsyncadd [#allocation4], 4294966400 }
  0xc8   :  { %316 = vsyncpa [#allocation3], 1 }
  0xc9   :  { %317 = vsyncpa [#allocation6], 1 }
  0xca   :  { %318 = vsyncpa [#allocation4], 1 }

</bundles_post_ra>
